<compile_context>
chip_gen: v6e
topology: v6e:2x2x1
jax: 0.10.0
libtpu: 0.0.40
codegen_flags: <defaults>
</compile_context>

<pallas_src>
import functools

import jax
import jax.numpy as jnp
from jax import lax
from jax.experimental import pallas as pl
from jax.experimental.pallas import tpu as pltpu

LN_EPS = 1e-4  # glow-tts attentions.LayerNorm default


def _round_up(x, m):
    return (x + m - 1) // m * m


def _pitch_kernel(x_ref, m_ref,
                  w1_ref, b1_ref, g1_ref, be1_ref,
                  w2_ref, b2_ref, g2_ref, be2_ref,
                  wp_ref, bp_ref,
                  o_ref, *, tile, K, pad):
    r2 = tile + 2 * pad  # conv1-output / conv2-input rows held per tile

    def conv(slab_bf16, rows, w_ref, b_ref):
        # Per-tap accumulated matmuls ("shift the outputs"):
        #   out[j] = sum_k (slab @ W_k)[j + k]
        # - no im2col lane-concat (taps never materialized on the lane axis),
        # - every MXU operand is a full sublane-aligned bf16 block,
        # - the K-1 shifted adds are cheap f32 sublane-offset slices.
        acc = None
        for k in range(K):
            y = jnp.dot(slab_bf16, w_ref[k], preferred_element_type=jnp.float32)
            yk = y[k:k + rows, :]
            acc = yk if acc is None else acc + yk
        return acc + b_ref[...]

    def layer_norm(h, g, be):
        # Two-pass centered statistics (numerically stronger than E[x^2]-E[x]^2).
        mean = jnp.mean(h, axis=-1, keepdims=True)
        c = h - mean
        var = jnp.mean(c * c, axis=-1, keepdims=True)
        return c * lax.rsqrt(var + LN_EPS) * g + be

    xw = x_ref[0]   # (tile + 4*pad, Cin) bf16, pre-masked, halo/apron rows included
    m2 = m_ref[0]   # (tile + 2*pad, 1)  f32 mask window

    # conv_1 -> relu -> norm_1   (dropout = identity at inference)
    h = conv(xw, r2, w1_ref, b1_ref)
    h = layer_norm(jnp.maximum(h, 0.0), g1_ref[...], be1_ref[...])

    # re-mask; single bf16 cast of the whole slab BEFORE any slicing (review item)
    hm = (h * m2).astype(jnp.bfloat16)                       # (r2, F)

    # conv_2 -> relu -> norm_2
    h2 = conv(hm, tile, w2_ref, b2_ref)
    h2 = layer_norm(jnp.maximum(h2, 0.0), g2_ref[...], be2_ref[...])

    # 1x1 projection (single output channel): VPU multiply + lane reduce.
    # The row-wise mask commutes with the lane reduce, so it is applied once to
    # the projected column (covers both the pre-proj and post-proj masks).
    proj = jnp.sum(h2 * wp_ref[...], axis=-1, keepdims=True) + bp_ref[...]
    # TODO(synk): pack the projection column into a lane-dense (tile//128, 128)
    # block for unmasked vst stores; the output is ~F x smaller than the
    # activations, so this is a store-slot saving only, left out for robustness.
    o_ref[0] = proj * m2[pad:pad + tile, :]


def pitch_predictor(x, x_mask, params, *, tile_rows=1024):
    """x: (B, T, Cin) f32, x_mask: (B, T, 1) f32.  Returns (B, T, 1) f32.

    Layout note: the PyTorch module is NCT; here time is on sublanes and
    channels on lanes (i.e. the PyTorch input transposed).
    """
    B, T, Cin = x.shape
    w1, b1, g1, be1, w2, b2, g2, be2, wp, bp = params
    K = w1.shape[0]
    F = w1.shape[2]
    pad = K // 2

    # Flat batch-folded row axis with per-sequence zero halos.
    T_pad = T + 2 * pad
    N = B * T_pad

    # Row tile (grid axis).  Per-row working set ~ 2*Cin + K*4*F + 2*F bytes, so
    # 1024-4096 row tiles stay well inside v7x's 64 MiB VMEM even at F=512;
    # v5e/v6e can take larger tiles.
    tile = min(_round_up(tile_rows, 8), _round_up(N, 8))
    n_tiles = pl.cdiv(N, tile)
    n_rows = n_tiles * tile
    r1 = tile + 4 * pad   # conv1 input rows per tile (2-conv receptive field)
    r2 = tile + 2 * pad   # conv1 output / conv2 input rows per tile

    # ---- wrapper-side layout plumbing (cheap XLA ops) ----
    xm = x * x_mask
    x_flat = jnp.pad(xm, ((0, 0), (pad, pad), (0, 0))).reshape(N, Cin)
    m_flat = jnp.pad(x_mask, ((0, 0), (pad, pad), (0, 0))).reshape(N, 1)
    # extend: leading/trailing apron + round the row count up to n_tiles*tile
    x_flat = jnp.pad(x_flat, ((2 * pad, n_rows - N + 2 * pad), (0, 0)))
    m_flat = jnp.pad(m_flat, ((pad, n_rows - N + pad), (0, 0)))

    # Materialize the overlapping halo windows on a tiled leading axis so every
    # BlockSpec is plain Blocked (auto double-buffered) and its trailing dims
    # equal the full array dims.
    rows1 = (jnp.arange(n_tiles)[:, None] * tile + jnp.arange(r1)[None, :]).reshape(-1)
    rows2 = (jnp.arange(n_tiles)[:, None] * tile + jnp.arange(r2)[None, :]).reshape(-1)
    x_tiles = jnp.take(x_flat.astype(jnp.bfloat16), rows1, axis=0).reshape(n_tiles, r1, Cin)
    m_tiles = jnp.take(m_flat, rows2, axis=0).reshape(n_tiles, r2, 1)

    # Per-tap weight matrices; bf16 MXU operands (accumulation stays f32).
    w1k = w1.astype(jnp.bfloat16)      # (K, Cin, F)
    w2k = w2.astype(jnp.bfloat16)      # (K, F, F)
    wp_row = wp.reshape(1, F)          # f32 (VPU projection path)

    kernel = functools.partial(_pitch_kernel, tile=tile, K=K, pad=pad)

    def const_spec(shape):
        # constant index_map -> block stays resident across grid steps
        return pl.BlockSpec(shape, lambda i, _s=shape: (0,) * len(_s))

    in_specs = [
        pl.BlockSpec((1, r1, Cin), lambda i: (i, 0, 0)),
        pl.BlockSpec((1, r2, 1), lambda i: (i, 0, 0)),
        const_spec((K, Cin, F)), const_spec((1, F)), const_spec((1, F)), const_spec((1, F)),
        const_spec((K, F, F)), const_spec((1, F)), const_spec((1, F)), const_spec((1, F)),
        const_spec((1, F)), const_spec((1, 1)),
    ]
    inputs = (x_tiles, m_tiles, w1k, b1, g1, be1, w2k, b2, g2, be2, wp_row, bp)

    cost = pl.CostEstimate(
        flops=int(2 * n_tiles * (r2 * K * Cin * F + tile * K * F * F) + 12 * n_rows * F),
        transcendentals=int(2 * n_rows),
        bytes_accessed=int(sum(a.size * a.dtype.itemsize for a in inputs)) + 4 * n_rows,
    )

    out_tiles = pl.pallas_call(
        kernel,
        out_shape=jax.ShapeDtypeStruct((n_tiles, tile, 1), jnp.float32),
        grid_spec=pltpu.PrefetchScalarGridSpec(
            num_scalar_prefetch=0,
            grid=(n_tiles,),
            in_specs=in_specs,
            out_specs=pl.BlockSpec((1, tile, 1), lambda i: (i, 0, 0)),
        ),
        compiler_params=pltpu.CompilerParams(
            dimension_semantics=("parallel",),      # megacore shards tiles on v7x
            vmem_limit_bytes=32 * 1024 * 1024,
        ),
        cost_estimate=cost,
    )(*inputs)

    out_flat = out_tiles.reshape(n_rows)[:N].reshape(B, T_pad)
    return out_flat[:, pad:pad + T, None]


# ---------------- pure-JAX f32 reference (correctness check) ----------------

def _conv1d_ref(x, w, b):
    # x: (B, T, Cin), w: (K, Cin, Cout), b: (1, Cout)
    K = w.shape[0]
    pad = K // 2
    T = x.shape[1]
    xp = jnp.pad(x, ((0, 0), (pad, pad), (0, 0)))
    out = sum(jnp.einsum('btc,cf->btf', xp[:, k:k + T], w[k]) for k in range(K))
    return out + b


def _layer_norm_ref(x, g, be):
    mean = jnp.mean(x, axis=-1, keepdims=True)
    var = jnp.mean((x - mean) ** 2, axis=-1, keepdims=True)
    return (x - mean) * lax.rsqrt(var + LN_EPS) * g + be


def pitch_predictor_ref(x, m, params):
    w1, b1, g1, be1, w2, b2, g2, be2, wp, bp = params
    h = jnp.maximum(_conv1d_ref(x * m, w1, b1), 0.0)
    h = _layer_norm_ref(h, g1, be1)
    h = jnp.maximum(_conv1d_ref(h * m, w2, b2), 0.0)
    h = _layer_norm_ref(h, g2, be2)
    out = jnp.einsum('btf,fo->bto', h * m, wp) + bp
    return out * m


# -----------------------------------------------------------------------------

if __name__ == "__main__":
    B, T = 2, 16
    in_channels, filter_channels, kernel_size = 8, 32, 3   # p_dropout irrelevant at inference

    key = jax.random.PRNGKey(0)
    ks = jax.random.split(key, 8)

    # Deterministic synthetic parameters (shapes follow the module's __init__).
    w1 = 0.1 * jax.random.normal(ks[0], (kernel_size, in_channels, filter_channels), jnp.float32)
    b1 = 0.1 * jax.random.normal(ks[1], (1, filter_channels), jnp.float32)
    g1 = jnp.ones((1, filter_channels), jnp.float32)
    be1 = jnp.zeros((1, filter_channels), jnp.float32)
    w2 = 0.1 * jax.random.normal(ks[2], (kernel_size, filter_channels, filter_channels), jnp.float32)
    b2 = 0.1 * jax.random.normal(ks[3], (1, filter_channels), jnp.float32)
    g2 = jnp.ones((1, filter_channels), jnp.float32)
    be2 = jnp.zeros((1, filter_channels), jnp.float32)
    wp = 0.1 * jax.random.normal(ks[4], (filter_channels, 1), jnp.float32)
    bp = 0.1 * jax.random.normal(ks[5], (1, 1), jnp.float32)
    params = (w1, b1, g1, be1, w2, b2, g2, be2, wp, bp)

    # Inputs (layout [B, T, C]; equivalent PyTorch input would be x.transpose(1, 2)).
    x = jax.random.normal(ks[6], (B, T, in_channels), jnp.float32)
    lengths = jnp.array([T, T // 2])
    x_mask = (jnp.arange(T)[None, :] < lengths[:, None]).astype(jnp.float32)[..., None]  # (B, T, 1)

    ref = pitch_predictor_ref(x, x_mask, params)

    # Default tile (single grid step at these tiny shapes).
    out = jax.block_until_ready(pitch_predictor(x, x_mask, params))
    assert out.shape == (B, T, 1)
    assert jnp.allclose(out, ref, atol=2e-2, rtol=2e-2), float(jnp.max(jnp.abs(out - ref)))

    # Small tile to exercise the halo-tiled multi-step grid path.
    out_tiled = jax.block_until_ready(pitch_predictor(x, x_mask, params, tile_rows=16))
    assert out_tiled.shape == (B, T, 1)
    assert jnp.allclose(out_tiled, ref, atol=2e-2, rtol=2e-2), float(jnp.max(jnp.abs(out_tiled - ref)))

    print("KERNEL_OK")
</pallas_src>

<mosaic_0001>
module attributes {stable_mosaic.version = 11 : i64} {
  func.func @_pitch_kernel(%arg0: i32, %arg1: memref<1x44x8xbf16, #tpu.memory_space<vmem>>, %arg2: memref<1x42x1xf32, #tpu.memory_space<vmem>>, %arg3: memref<3x8x32xbf16, #tpu.memory_space<vmem>>, %arg4: memref<1x32xf32, #tpu.memory_space<vmem>>, %arg5: memref<1x32xf32, #tpu.memory_space<vmem>>, %arg6: memref<1x32xf32, #tpu.memory_space<vmem>>, %arg7: memref<3x32x32xbf16, #tpu.memory_space<vmem>>, %arg8: memref<1x32xf32, #tpu.memory_space<vmem>>, %arg9: memref<1x32xf32, #tpu.memory_space<vmem>>, %arg10: memref<1x32xf32, #tpu.memory_space<vmem>>, %arg11: memref<1x32xf32, #tpu.memory_space<vmem>>, %arg12: memref<1x1xf32, #tpu.memory_space<vmem>>, %arg13: memref<1x40x1xf32, #tpu.memory_space<vmem>>) attributes {dimension_semantics = [#tpu.dimension_semantics<parallel>], iteration_bounds = array<i64: 1>, scalar_prefetch = 0 : i64, scratch_operands = 0 : i64, tpu.core_type = #tpu.core_type<tc>, window_params = [{transform_indices = @transform_0, window_bounds = array<i64: 1, 44, 8>}, {transform_indices = @transform_1, window_bounds = array<i64: 1, 42, 1>}, {pipeline_mode = #tpu.pipeline_mode<synchronous>, transform_indices = @transform_2, window_bounds = array<i64: 3, 8, 32>}, {pipeline_mode = #tpu.pipeline_mode<synchronous>, transform_indices = @transform_3, window_bounds = array<i64: 1, 32>}, {pipeline_mode = #tpu.pipeline_mode<synchronous>, transform_indices = @transform_4, window_bounds = array<i64: 1, 32>}, {pipeline_mode = #tpu.pipeline_mode<synchronous>, transform_indices = @transform_5, window_bounds = array<i64: 1, 32>}, {pipeline_mode = #tpu.pipeline_mode<synchronous>, transform_indices = @transform_6, window_bounds = array<i64: 3, 32, 32>}, {pipeline_mode = #tpu.pipeline_mode<synchronous>, transform_indices = @transform_7, window_bounds = array<i64: 1, 32>}, {pipeline_mode = #tpu.pipeline_mode<synchronous>, transform_indices = @transform_8, window_bounds = array<i64: 1, 32>}, {pipeline_mode = #tpu.pipeline_mode<synchronous>, transform_indices = @transform_9, window_bounds = array<i64: 1, 32>}, {pipeline_mode = #tpu.pipeline_mode<synchronous>, transform_indices = @transform_10, window_bounds = array<i64: 1, 32>}, {pipeline_mode = #tpu.pipeline_mode<synchronous>, transform_indices = @transform_11, window_bounds = array<i64: 1, 1>}, {transform_indices = @transform_12, window_bounds = array<i64: 1, 40, 1>}]} {
    %c0 = arith.constant 0 : index
    %c0_0 = arith.constant 0 : index
    %c0_1 = arith.constant 0 : index
    %0 = vector.load %arg1[%c0, %c0_0, %c0_1] : memref<1x44x8xbf16, #tpu.memory_space<vmem>>, vector<1x44x8xbf16>
    %1 = vector.shape_cast %0 : vector<1x44x8xbf16> to vector<44x8xbf16>
    %c0_2 = arith.constant 0 : index
    %c0_3 = arith.constant 0 : index
    %c0_4 = arith.constant 0 : index
    %2 = vector.load %arg2[%c0_2, %c0_3, %c0_4] : memref<1x42x1xf32, #tpu.memory_space<vmem>>, vector<1x42x1xf32>
    %3 = vector.shape_cast %2 : vector<1x42x1xf32> to vector<42x1xf32>
    %c0_5 = arith.constant 0 : index
    %c0_6 = arith.constant 0 : index
    %c0_7 = arith.constant 0 : index
    %4 = vector.load %arg3[%c0_5, %c0_6, %c0_7] : memref<3x8x32xbf16, #tpu.memory_space<vmem>>, vector<1x8x32xbf16>
    %5 = vector.shape_cast %4 : vector<1x8x32xbf16> to vector<8x32xbf16>
    %cst = arith.constant dense<0.000000e+00> : vector<44x32xf32>
    %6 = tpu.matmul %1, %5, %cst {dimension_numbers = #tpu.dot_dimension_numbers<[1], [0], [0], [1], [0, 0, 1, 1], [], []>} : vector<44x8xbf16>, vector<8x32xbf16>, vector<44x32xf32> -> vector<44x32xf32>
    %7 = vector.extract_strided_slice %6 {offsets = [0, 0], sizes = [42, 32], strides = [1, 1]} : vector<44x32xf32> to vector<42x32xf32>
    %c1 = arith.constant 1 : index
    %c0_8 = arith.constant 0 : index
    %c0_9 = arith.constant 0 : index
    %8 = vector.load %arg3[%c1, %c0_8, %c0_9] : memref<3x8x32xbf16, #tpu.memory_space<vmem>>, vector<1x8x32xbf16>
    %9 = vector.shape_cast %8 : vector<1x8x32xbf16> to vector<8x32xbf16>
    %cst_10 = arith.constant dense<0.000000e+00> : vector<44x32xf32>
    %10 = tpu.matmul %1, %9, %cst_10 {dimension_numbers = #tpu.dot_dimension_numbers<[1], [0], [0], [1], [0, 0, 1, 1], [], []>} : vector<44x8xbf16>, vector<8x32xbf16>, vector<44x32xf32> -> vector<44x32xf32>
    %11 = vector.extract_strided_slice %10 {offsets = [1, 0], sizes = [42, 32], strides = [1, 1]} : vector<44x32xf32> to vector<42x32xf32>
    %12 = arith.addf %7, %11 : vector<42x32xf32>
    %c2 = arith.constant 2 : index
    %c0_11 = arith.constant 0 : index
    %c0_12 = arith.constant 0 : index
    %13 = vector.load %arg3[%c2, %c0_11, %c0_12] : memref<3x8x32xbf16, #tpu.memory_space<vmem>>, vector<1x8x32xbf16>
    %14 = vector.shape_cast %13 : vector<1x8x32xbf16> to vector<8x32xbf16>
    %cst_13 = arith.constant dense<0.000000e+00> : vector<44x32xf32>
    %15 = tpu.matmul %1, %14, %cst_13 {dimension_numbers = #tpu.dot_dimension_numbers<[1], [0], [0], [1], [0, 0, 1, 1], [], []>} : vector<44x8xbf16>, vector<8x32xbf16>, vector<44x32xf32> -> vector<44x32xf32>
    %16 = vector.extract_strided_slice %15 {offsets = [2, 0], sizes = [42, 32], strides = [1, 1]} : vector<44x32xf32> to vector<42x32xf32>
    %17 = arith.addf %12, %16 : vector<42x32xf32>
    %c0_14 = arith.constant 0 : index
    %c0_15 = arith.constant 0 : index
    %18 = vector.load %arg4[%c0_14, %c0_15] : memref<1x32xf32, #tpu.memory_space<vmem>>, vector<1x32xf32>
    %19 = vector.broadcast %18 : vector<1x32xf32> to vector<42x32xf32>
    %20 = arith.addf %17, %19 : vector<42x32xf32>
    %cst_16 = arith.constant 0.000000e+00 : f32
    %21 = vector.broadcast %cst_16 : f32 to vector<42x32xf32>
    %22 = arith.maximumf %20, %21 : vector<42x32xf32>
    %c0_17 = arith.constant 0 : index
    %c0_18 = arith.constant 0 : index
    %23 = vector.load %arg5[%c0_17, %c0_18] : memref<1x32xf32, #tpu.memory_space<vmem>>, vector<1x32xf32>
    %c0_19 = arith.constant 0 : index
    %c0_20 = arith.constant 0 : index
    %24 = vector.load %arg6[%c0_19, %c0_20] : memref<1x32xf32, #tpu.memory_space<vmem>>, vector<1x32xf32>
    %cst_21 = arith.constant dense<0.000000e+00> : vector<42xf32>
    %25 = vector.multi_reduction <add>, %22, %cst_21 [1] : vector<42x32xf32> to vector<42xf32>
    %26 = vector.shape_cast %25 : vector<42xf32> to vector<42x1xf32>
    %cst_22 = arith.constant 3.200000e+01 : f32
    %27 = vector.broadcast %cst_22 : f32 to vector<42x1xf32>
    %28 = arith.divf %26, %27 : vector<42x1xf32>
    %29 = vector.broadcast %28 : vector<42x1xf32> to vector<42x32xf32>
    %30 = arith.subf %22, %29 : vector<42x32xf32>
    %31 = arith.mulf %30, %30 : vector<42x32xf32>
    %cst_23 = arith.constant dense<0.000000e+00> : vector<42xf32>
    %32 = vector.multi_reduction <add>, %31, %cst_23 [1] : vector<42x32xf32> to vector<42xf32>
    %33 = vector.shape_cast %32 : vector<42xf32> to vector<42x1xf32>
    %cst_24 = arith.constant 3.200000e+01 : f32
    %34 = vector.broadcast %cst_24 : f32 to vector<42x1xf32>
    %35 = arith.divf %33, %34 : vector<42x1xf32>
    %cst_25 = arith.constant 9.99999974E-5 : f32
    %36 = vector.broadcast %cst_25 : f32 to vector<42x1xf32>
    %37 = arith.addf %35, %36 : vector<42x1xf32>
    %38 = math.rsqrt %37 : vector<42x1xf32>
    %39 = vector.broadcast %38 : vector<42x1xf32> to vector<42x32xf32>
    %40 = arith.mulf %30, %39 : vector<42x32xf32>
    %41 = vector.broadcast %23 : vector<1x32xf32> to vector<42x32xf32>
    %42 = arith.mulf %40, %41 : vector<42x32xf32>
    %43 = vector.broadcast %24 : vector<1x32xf32> to vector<42x32xf32>
    %44 = arith.addf %42, %43 : vector<42x32xf32>
    %45 = vector.broadcast %3 : vector<42x1xf32> to vector<42x32xf32>
    %46 = arith.mulf %44, %45 : vector<42x32xf32>
    %47 = arith.truncf %46 : vector<42x32xf32> to vector<42x32xbf16>
    %c0_26 = arith.constant 0 : index
    %c0_27 = arith.constant 0 : index
    %c0_28 = arith.constant 0 : index
    %48 = vector.load %arg7[%c0_26, %c0_27, %c0_28] : memref<3x32x32xbf16, #tpu.memory_space<vmem>>, vector<1x32x32xbf16>
    %49 = vector.shape_cast %48 : vector<1x32x32xbf16> to vector<32x32xbf16>
    %cst_29 = arith.constant dense<0.000000e+00> : vector<42x32xf32>
    %50 = tpu.matmul %47, %49, %cst_29 {dimension_numbers = #tpu.dot_dimension_numbers<[1], [0], [0], [1], [0, 0, 1, 1], [], []>} : vector<42x32xbf16>, vector<32x32xbf16>, vector<42x32xf32> -> vector<42x32xf32>
    %51 = vector.extract_strided_slice %50 {offsets = [0, 0], sizes = [40, 32], strides = [1, 1]} : vector<42x32xf32> to vector<40x32xf32>
    %c1_30 = arith.constant 1 : index
    %c0_31 = arith.constant 0 : index
    %c0_32 = arith.constant 0 : index
    %52 = vector.load %arg7[%c1_30, %c0_31, %c0_32] : memref<3x32x32xbf16, #tpu.memory_space<vmem>>, vector<1x32x32xbf16>
    %53 = vector.shape_cast %52 : vector<1x32x32xbf16> to vector<32x32xbf16>
    %cst_33 = arith.constant dense<0.000000e+00> : vector<42x32xf32>
    %54 = tpu.matmul %47, %53, %cst_33 {dimension_numbers = #tpu.dot_dimension_numbers<[1], [0], [0], [1], [0, 0, 1, 1], [], []>} : vector<42x32xbf16>, vector<32x32xbf16>, vector<42x32xf32> -> vector<42x32xf32>
    %55 = vector.extract_strided_slice %54 {offsets = [1, 0], sizes = [40, 32], strides = [1, 1]} : vector<42x32xf32> to vector<40x32xf32>
    %56 = arith.addf %51, %55 : vector<40x32xf32>
    %c2_34 = arith.constant 2 : index
    %c0_35 = arith.constant 0 : index
    %c0_36 = arith.constant 0 : index
    %57 = vector.load %arg7[%c2_34, %c0_35, %c0_36] : memref<3x32x32xbf16, #tpu.memory_space<vmem>>, vector<1x32x32xbf16>
    %58 = vector.shape_cast %57 : vector<1x32x32xbf16> to vector<32x32xbf16>
    %cst_37 = arith.constant dense<0.000000e+00> : vector<42x32xf32>
    %59 = tpu.matmul %47, %58, %cst_37 {dimension_numbers = #tpu.dot_dimension_numbers<[1], [0], [0], [1], [0, 0, 1, 1], [], []>} : vector<42x32xbf16>, vector<32x32xbf16>, vector<42x32xf32> -> vector<42x32xf32>
    %60 = vector.extract_strided_slice %59 {offsets = [2, 0], sizes = [40, 32], strides = [1, 1]} : vector<42x32xf32> to vector<40x32xf32>
    %61 = arith.addf %56, %60 : vector<40x32xf32>
    %c0_38 = arith.constant 0 : index
    %c0_39 = arith.constant 0 : index
    %62 = vector.load %arg8[%c0_38, %c0_39] : memref<1x32xf32, #tpu.memory_space<vmem>>, vector<1x32xf32>
    %63 = vector.broadcast %62 : vector<1x32xf32> to vector<40x32xf32>
    %64 = arith.addf %61, %63 : vector<40x32xf32>
    %cst_40 = arith.constant 0.000000e+00 : f32
    %65 = vector.broadcast %cst_40 : f32 to vector<40x32xf32>
    %66 = arith.maximumf %64, %65 : vector<40x32xf32>
    %c0_41 = arith.constant 0 : index
    %c0_42 = arith.constant 0 : index
    %67 = vector.load %arg9[%c0_41, %c0_42] : memref<1x32xf32, #tpu.memory_space<vmem>>, vector<1x32xf32>
    %c0_43 = arith.constant 0 : index
    %c0_44 = arith.constant 0 : index
    %68 = vector.load %arg10[%c0_43, %c0_44] : memref<1x32xf32, #tpu.memory_space<vmem>>, vector<1x32xf32>
    %cst_45 = arith.constant dense<0.000000e+00> : vector<40xf32>
    %69 = vector.multi_reduction <add>, %66, %cst_45 [1] : vector<40x32xf32> to vector<40xf32>
    %70 = vector.shape_cast %69 : vector<40xf32> to vector<40x1xf32>
    %cst_46 = arith.constant 3.200000e+01 : f32
    %71 = vector.broadcast %cst_46 : f32 to vector<40x1xf32>
    %72 = arith.divf %70, %71 : vector<40x1xf32>
    %73 = vector.broadcast %72 : vector<40x1xf32> to vector<40x32xf32>
    %74 = arith.subf %66, %73 : vector<40x32xf32>
    %75 = arith.mulf %74, %74 : vector<40x32xf32>
    %cst_47 = arith.constant dense<0.000000e+00> : vector<40xf32>
    %76 = vector.multi_reduction <add>, %75, %cst_47 [1] : vector<40x32xf32> to vector<40xf32>
    %77 = vector.shape_cast %76 : vector<40xf32> to vector<40x1xf32>
    %cst_48 = arith.constant 3.200000e+01 : f32
    %78 = vector.broadcast %cst_48 : f32 to vector<40x1xf32>
    %79 = arith.divf %77, %78 : vector<40x1xf32>
    %cst_49 = arith.constant 9.99999974E-5 : f32
    %80 = vector.broadcast %cst_49 : f32 to vector<40x1xf32>
    %81 = arith.addf %79, %80 : vector<40x1xf32>
    %82 = math.rsqrt %81 : vector<40x1xf32>
    %83 = vector.broadcast %82 : vector<40x1xf32> to vector<40x32xf32>
    %84 = arith.mulf %74, %83 : vector<40x32xf32>
    %85 = vector.broadcast %67 : vector<1x32xf32> to vector<40x32xf32>
    %86 = arith.mulf %84, %85 : vector<40x32xf32>
    %87 = vector.broadcast %68 : vector<1x32xf32> to vector<40x32xf32>
    %88 = arith.addf %86, %87 : vector<40x32xf32>
    %c0_50 = arith.constant 0 : index
    %c0_51 = arith.constant 0 : index
    %89 = vector.load %arg11[%c0_50, %c0_51] : memref<1x32xf32, #tpu.memory_space<vmem>>, vector<1x32xf32>
    %90 = vector.broadcast %89 : vector<1x32xf32> to vector<40x32xf32>
    %91 = arith.mulf %88, %90 : vector<40x32xf32>
    %cst_52 = arith.constant dense<0.000000e+00> : vector<40xf32>
    %92 = vector.multi_reduction <add>, %91, %cst_52 [1] : vector<40x32xf32> to vector<40xf32>
    %93 = vector.shape_cast %92 : vector<40xf32> to vector<40x1xf32>
    %c0_53 = arith.constant 0 : index
    %c0_54 = arith.constant 0 : index
    %94 = vector.load %arg12[%c0_53, %c0_54] : memref<1x1xf32, #tpu.memory_space<vmem>>, vector<1x1xf32>
    %95 = vector.broadcast %94 : vector<1x1xf32> to vector<40x1xf32>
    %96 = arith.addf %93, %95 : vector<40x1xf32>
    %97 = vector.extract_strided_slice %3 {offsets = [1, 0], sizes = [40, 1], strides = [1, 1]} : vector<42x1xf32> to vector<40x1xf32>
    %98 = arith.mulf %96, %97 : vector<40x1xf32>
    %c0_55 = arith.constant 0 : index
    %c0_56 = arith.constant 0 : index
    %c0_57 = arith.constant 0 : index
    %99 = vector.load %arg13[%c0_55, %c0_56, %c0_57] : memref<1x40x1xf32, #tpu.memory_space<vmem>>, vector<1x40x1xf32>
    %100 = vector.shape_cast %99 : vector<1x40x1xf32> to vector<40x1xf32>
    %101 = vector.shape_cast %98 : vector<40x1xf32> to vector<1x40x1xf32>
    tpu.vector_store %arg13[%c0_55, %c0_56, %c0_57], %101 {strides = array<i32>} : memref<1x40x1xf32, #tpu.memory_space<vmem>>, vector<1x40x1xf32>,
    return
  }
  func.func @transform_0(%arg0: i32) -> (i32, i32, i32) {
    %c0_i32 = arith.constant 0 : i32
    %c0_i32_0 = arith.constant 0 : i32
    %c0_i32_1 = arith.constant 0 : i32
    return %arg0, %c0_i32, %c0_i32_0 : i32, i32, i32
  }
  func.func @transform_1(%arg0: i32) -> (i32, i32, i32) {
    %c0_i32 = arith.constant 0 : i32
    %c0_i32_0 = arith.constant 0 : i32
    %c0_i32_1 = arith.constant 0 : i32
    return %arg0, %c0_i32, %c0_i32_0 : i32, i32, i32
  }
  func.func @transform_2(%arg0: i32) -> (i32, i32, i32) {
    %c0_i32 = arith.constant 0 : i32
    %c0_i32_0 = arith.constant 0 : i32
    %c0_i32_1 = arith.constant 0 : i32
    %c0_i32_2 = arith.constant 0 : i32
    return %c0_i32, %c0_i32_0, %c0_i32_1 : i32, i32, i32
  }
  func.func @transform_3(%arg0: i32) -> (i32, i32) {
    %c0_i32 = arith.constant 0 : i32
    %c0_i32_0 = arith.constant 0 : i32
    %c0_i32_1 = arith.constant 0 : i32
    return %c0_i32, %c0_i32_0 : i32, i32
  }
  func.func @transform_4(%arg0: i32) -> (i32, i32) {
    %c0_i32 = arith.constant 0 : i32
    %c0_i32_0 = arith.constant 0 : i32
    %c0_i32_1 = arith.constant 0 : i32
    return %c0_i32, %c0_i32_0 : i32, i32
  }
  func.func @transform_5(%arg0: i32) -> (i32, i32) {
    %c0_i32 = arith.constant 0 : i32
    %c0_i32_0 = arith.constant 0 : i32
    %c0_i32_1 = arith.constant 0 : i32
    return %c0_i32, %c0_i32_0 : i32, i32
  }
  func.func @transform_6(%arg0: i32) -> (i32, i32, i32) {
    %c0_i32 = arith.constant 0 : i32
    %c0_i32_0 = arith.constant 0 : i32
    %c0_i32_1 = arith.constant 0 : i32
    %c0_i32_2 = arith.constant 0 : i32
    return %c0_i32, %c0_i32_0, %c0_i32_1 : i32, i32, i32
  }
  func.func @transform_7(%arg0: i32) -> (i32, i32) {
    %c0_i32 = arith.constant 0 : i32
    %c0_i32_0 = arith.constant 0 : i32
    %c0_i32_1 = arith.constant 0 : i32
    return %c0_i32, %c0_i32_0 : i32, i32
  }
  func.func @transform_8(%arg0: i32) -> (i32, i32) {
    %c0_i32 = arith.constant 0 : i32
    %c0_i32_0 = arith.constant 0 : i32
    %c0_i32_1 = arith.constant 0 : i32
    return %c0_i32, %c0_i32_0 : i32, i32
  }
  func.func @transform_9(%arg0: i32) -> (i32, i32) {
    %c0_i32 = arith.constant 0 : i32
    %c0_i32_0 = arith.constant 0 : i32
    %c0_i32_1 = arith.constant 0 : i32
    return %c0_i32, %c0_i32_0 : i32, i32
  }
  func.func @transform_10(%arg0: i32) -> (i32, i32) {
    %c0_i32 = arith.constant 0 : i32
    %c0_i32_0 = arith.constant 0 : i32
    %c0_i32_1 = arith.constant 0 : i32
    return %c0_i32, %c0_i32_0 : i32, i32
  }
  func.func @transform_11(%arg0: i32) -> (i32, i32) {
    %c0_i32 = arith.constant 0 : i32
    %c0_i32_0 = arith.constant 0 : i32
    %c0_i32_1 = arith.constant 0 : i32
    return %c0_i32, %c0_i32_0 : i32, i32
  }
  func.func @transform_12(%arg0: i32) -> (i32, i32, i32) {
    %c0_i32 = arith.constant 0 : i32
    %c0_i32_0 = arith.constant 0 : i32
    %c0_i32_1 = arith.constant 0 : i32
    return %arg0, %c0_i32, %c0_i32_0 : i32, i32, i32
  }
}

</mosaic_0001>

<bundles_post_ra>
// kernel: tpu_custom_call.1
= control target key start
LH: loop header
LB: loop body
LE: loop exit
PB: predicated region body
PF: predicated region fallthrough
CT: control target
= control target key end

     0   :  { %vm82_vm0 = vcmask 1043456   ;;  %v1149_v0 = vmov 0.0   ;;  %vm1150_vm1 = vmmov 0   ;;  %vm72_vm2 = vcmask 64512   ;;  %s1490_s2 = inlined_call_operand.vmem [shape: bf16[3,8,32], index: 2, kind: input, shape index: {}]   ;;  %s1491_s0 = inlined_call_operand.vmem [shape: bf16[1,44,8], index: 0, kind: input, shape index: {}]   ;;  %s1492_s3 = inlined_call_operand.vmem [shape: f32[1,32], index: 3, kind: input, shape index: {}]   ;;  %s1493_s6 = inlined_call_operand.vmem [shape: bf16[3,32,32], index: 6, kind: input, shape index: {}]   ;;  %s1494_s1 = inlined_call_operand.vmem [shape: f32[1,42,1], index: 1, kind: input, shape index: {}]   ;;  %s1495_s4 = inlined_call_operand.vmem [shape: f32[1,32], index: 4, kind: input, shape index: {}]   ;;  %s1496_s5 = inlined_call_operand.vmem [shape: f32[1,32], index: 5, kind: input, shape index: {}]   ;;  %s1497_s7 = inlined_call_operand.vmem [shape: f32[1,32], index: 7, kind: input, shape index: {}]   ;;  %s1498_s11 = inlined_call_operand.<no memory space> [shape: f32[1,1], index: 11, kind: input, shape index: {}]   ;;  %s1499_s8 = inlined_call_operand.vmem [shape: f32[1,32], index: 8, kind: input, shape index: {}]   ;;  %s1500_s9 = inlined_call_operand.vmem [shape: f32[1,32], index: 9, kind: input, shape index: {}]   ;;  %s1501_s10 = inlined_call_operand.vmem [shape: f32[1,32], index: 10, kind: input, shape index: {}]   ;;  %s1502_s12 = inlined_call_operand.vmem [shape: f32[1,40,1], index: 12, kind: output, shape index: {}]  }
   0x1   :  { %1023 = vmatprep.subr.bf16.mxu0 %v1149_v0  ;;  %1037 = vmatprep.subr.bf16.mxu1 %v1149_v0  ;;  %v56_v1 = vld [vmem:[%s1490_s2] sm:$0xf]  ;;  %v957_v2 = vld [vmem:[%s1490_s2 + $0x4] sm:$0xf]  ;;  %v961_v6 = vld [vmem:[%s1490_s2 + $0x8] sm:$0xf] }
   0x2   :  { %v84_v3 = vsel %vm82_vm0, %v56_v1, 0  ;;  %v146_v4 = vsel %vm82_vm0, %v957_v2, 0  ;;  %1025 = vmatprep.mubr.msk.bf16.mxu0 %vm1150_vm1, %v1149_v0  ;;  %1039 = vmatprep.mubr.msk.bf16.mxu1 %vm1150_vm1, %v1149_v0  ;;  %v1118_v5 = vld [vmem:[%s1491_s0] sm:$0xff]   ;;  %v238_v7 = vsel %vm82_vm0, %v961_v6, 0  ;;  %v1119_v8 = vld [vmem:[%s1491_s0 + $0x8] sm:$0xff]   ;;  %vm211_vm3 = vcmask 1046528  }
   0x3   :  { %1024 = vmatpush3.bf16.msra.mxu0 %v84_v3  ;;  %1038 = vmatpush3.bf16.msra.mxu1 %v146_v4  ;;  %v1120_v9 = vld [vmem:[%s1491_s0 + $0x10] sm:$0x3f]   ;;  %vm303_vm4 = vcmask 1045504   ;;  %v965_v48 = vld [vmem:[%s1492_s3] ss:$0 sm:$0xff]  ;;  %vm348_vm5 = vcmask 261120  }
   0x4   :  { %1051 = vmatprep.subr.bf16.mxu0 %v1149_v0  ;;  %1065 = vmatprep.subr.bf16.mxu1 %v1149_v0  ;;  %vm364_vm6 = vcmask 254976   ;;  %vm941_vm7 = vcmask 7168  }
   0x6   :  { %1026 = vmatmul.mubr.msk.bf16.vlgmr.msra.gmra.mxu0 %vm72_vm2, %v1118_v5  ;;  %1040 = vmatmul.mubr.msk.bf16.vlgmr.msra.gmra.mxu1 %vm72_vm2, %v1118_v5 }
   0x7   :  { %1052 = vmatpush3.bf16.msra.mxu0 %v238_v7  ;;  %1029 = vmatprep.mubr.msk.bf16.mxu0 %vm1150_vm1, %v1149_v0 }
   0x8   :  { %1043 = vmatprep.mubr.msk.bf16.mxu1 %vm1150_vm1, %v1149_v0  ;;  %1081 = vmatprep.subr.bf16.mxu0 %v1149_v0 }
   0xe   :  { %1030 = vmatmul.mubr.msk.bf16.gmra.mxu0 %vm72_vm2, %v1119_v8  ;;  %1044 = vmatmul.mubr.msk.bf16.gmra.mxu1 %vm72_vm2, %v1119_v8 }
   0xf   :  { %1033 = vmatprep.mubr.msk.bf16.mxu0 %vm1150_vm1, %v1149_v0  ;;  %1047 = vmatprep.mubr.msk.bf16.mxu1 %vm1150_vm1, %v1149_v0 }
  0x16   :  { %1034 = vmatmul.mubr.msk.bf16.gmra.mxu0 %vm72_vm2, %v1120_v9  ;;  %1048 = vmatmul.mubr.msk.bf16.gmra.mxu1 %vm72_vm2, %v1120_v9 }
  0x17   :  { %1053 = vmatprep.mubr.msk.bf16.mxu0 %vm1150_vm1, %v1149_v0  ;;  %1069 = vmatprep.mubr.msk.bf16.mxu1 %vm1150_vm1, %v1149_v0 }
  0x1e   :  { %1054 = vmatmul.mubr.msk.bf16.vlgmr.msra.gmra.mxu0 %vm72_vm2, %v1118_v5 }
  0x1f   :  { %1057 = vmatprep.mubr.msk.bf16.mxu0 %vm1150_vm1, %v1149_v0 }
  0x26   :  { %1058 = vmatmul.mubr.msk.bf16.gmra.mxu0 %vm72_vm2, %v1119_v8 }
  0x27   :  { %1061 = vmatprep.mubr.msk.bf16.mxu0 %vm1150_vm1, %v1149_v0 }
  0x2e   :  { %1062 = vmatmul.mubr.msk.bf16.gmra.mxu0 %vm72_vm2, %v1120_v9 }
  0x2f   :  { %1085 = vmatprep.mubr.msk.bf16.mxu0 %vm1150_vm1, %v1149_v0 }
  0xc6   :  { %v120_v10 = vpop.f32.mrf.mxu0  ;;  %v182_v11 = vpop.f32.mrf.mxu1 }
  0xc7   :  { %v212_v34 = vrot.slane %v182_v11, 1 }
  0xc8   :  { %v1027_v12 = vpop.f32.mrf.mxu0  ;;  %v1041_v13 = vpop.f32.mrf.mxu1 }
  0xca   :  { %v123_v14 = vpop.f32.mrf.mxu0  ;;  %v185_v15 = vpop.f32.mrf.mxu1 }
  0xcb   :  { %v213_v35 = vrot.slane %v185_v15, 1 }
  0xcc   :  { %v1028_v16 = vpop.f32.mrf.mxu0  ;;  %v1042_v17 = vpop.f32.mrf.mxu1 }
  0xcd   :  { %v214_v38 = vsel %vm211_vm3, %v212_v34, %v213_v35 }
  0xce   :  { %v128_v18 = vpop.f32.mrf.mxu0  ;;  %v190_v19 = vpop.f32.mrf.mxu1  ;;  %v229_v43 = vadd.f32 %v214_v38, %v120_v10 }
  0xcf   :  { %v215_v39 = vrot.slane %v190_v19, 1 }
  0xd0   :  { %v1031_v20 = vpop.f32.mrf.mxu0  ;;  %v1045_v21 = vpop.f32.mrf.mxu1 }
  0xd1   :  { %v216_v45 = vsel %vm211_vm3, %v213_v35, %v215_v39 }
  0xd2   :  { %v131_v22 = vpop.f32.mrf.mxu0  ;;  %v193_v23 = vpop.f32.mrf.mxu1  ;;  %v230_v52 = vadd.f32 %v216_v45, %v123_v14 }
  0xd3   :  { %v217_v46 = vrot.slane %v193_v23, 1 }
  0xd4   :  { %v1032_v24 = vpop.f32.mrf.mxu0  ;;  %v1046_v25 = vpop.f32.mrf.mxu1 }
  0xd5   :  { %v218_v55 = vsel %vm211_vm3, %v215_v39, %v217_v46 }
  0xd6   :  { %v1274_v26 = vpop.f32.mrf.mxu0  ;;  %v198_v27 = vpop.f32.mrf.mxu1  ;;  %v231_v62 = vadd.f32 %v218_v55, %v128_v18 }
  0xd7   :  { %v219_v56 = vrot.slane %v198_v27, 1 }
  0xd8   :  { %v1035_v28 = vpop.f32.mrf.mxu0  ;;  %v1049_v29 = vpop.f32.mrf.mxu1 }
  0xd9   :  { %v220_v3 = vsel %vm211_vm3, %v217_v46, %v219_v56 }
  0xda   :  { %v139_v30 = vpop.f32.mrf.mxu0  ;;  %v201_v31 = vpop.f32.mrf.mxu1  ;;  %v232_v10 = vadd.f32 %v220_v3, %v131_v22 }
  0xdb   :  { %v221_v4 = vrot.slane %v201_v31, 1 }
  0xdc   :  { %v1036_v32 = vpop.f32.mrf.mxu0  ;;  %v1050_v33 = vpop.f32.mrf.mxu1 }
  0xdd   :  { %v222_v14 = vsel %vm211_vm3, %v219_v56, %v221_v4  ;;  %v234_v19 = vadd.f32 %v221_v4, %v139_v30  ;;  %v1121_v4 = vld [vmem:[%s1493_s6 + $0x8] sm:$0xff]  }
  0xde   :  { %v274_v36 = vpop.f32.mrf.mxu0  ;;  %v233_v21 = vadd.f32 %v222_v14, %v1274_v26  ;;  %1066 = vmatpush3.bf16.msra.mxu1 %v1121_v4 }
  0xdf   :  { %v304_v41 = vrot.slane %v274_v36, 2  ;;  %v1151_v36 = vmov 0   ;;  %1067 = vmatprep.subr.bf16.mxu1 %v1149_v0 }
  0xe0   :  { %v1055_v37 = vpop.f32.mrf.mxu0  ;;  %1117 = vset.pattern.permute.xlu1 %v1151_v36  ;;  %1116 = vset.pattern.permute.xlu0 %v1151_v36 }
  0xe2   :  { %v277_v40 = vpop.f32.mrf.mxu0 }
  0xe3   :  { %v305_v42 = vrot.slane %v277_v40, 2 }
  0xe4   :  { %v1056_v44 = vpop.f32.mrf.mxu0 }
  0xe5   :  { %v306_v47 = vsel %vm303_vm4, %v304_v41, %v305_v42 }
  0xe6   :  { %v282_v49 = vpop.f32.mrf.mxu0  ;;  %v321_v50 = vadd.f32 %v306_v47, %v229_v43 }
  0xe7   :  { %v307_v51 = vrot.slane %v282_v49, 2 }
  0xe8   :  { %v1059_v53 = vpop.f32.mrf.mxu0  ;;  %v334_v54 = vadd.f32 %v965_v48, %v321_v50 }
  0xe9   :  { %v308_v57 = vsel %vm303_vm4, %v305_v42, %v307_v51 }
  0xea   :  { %v285_v58 = vpop.f32.mrf.mxu0  ;;  %v340_v59 = vmax.f32 %v334_v54, 0.0  ;;  %v322_v60 = vadd.f32 %v308_v57, %v230_v52 }
  0xeb   :  { %v309_v61 = vrot.slane %v285_v58, 2 }
  0xec   :  { %v1060_v63 = vpop.f32.mrf.mxu0  ;;  %v349_v1 = vsel %vm348_vm5, %v340_v59, 0.0  ;;  %v335_v2 = vadd.f32 %v965_v48, %v322_v60 }
  0xed   :  { %v310_v5 = vsel %vm303_vm4, %v307_v51, %v309_v61  ;;  %350 = vadd.xlane.f32.xlu0 %v349_v1 }
  0xee   :  { %v290_v6 = vpop.f32.mrf.mxu0  ;;  %v341_v7 = vmax.f32 %v335_v2, 0.0  ;;  %v323_v8 = vadd.f32 %v310_v5, %v231_v62  ;;  %v1333_v5 = vld [vmem:[%s1494_s1 + $0x8] sm:$0xff] }
  0xef   :  { %v311_v9 = vrot.slane %v290_v6, 2  ;;  %v1339_v6 = vld [vmem:[%s1494_s1 + $0x10] sm:$0xff] }
  0xf0   :  { %v1063_v11 = vpop.f32.mrf.mxu0  ;;  %v352_v12 = vsel %vm348_vm5, %v341_v7, 0.0  ;;  %v336_v13 = vadd.f32 %v965_v48, %v323_v8  ;;  %v1347_v8 = vld [vmem:[%s1494_s1] sm:$0xff] }
  0xf1   :  { %v312_v15 = vsel %vm303_vm4, %v309_v61, %v311_v9  ;;  %353 = vadd.xlane.f32.xlu0 %v352_v12  ;;  %v1124_v11 = vld [vmem:[%s1493_s6 + $0x10] sm:$0xff]   ;;  %v1368_v12 = vld [vmem:[%s1494_s1 + $0x20] sm:$0xff] }
  0xf2   :  { %v293_v16 = vpop.f32.mrf.mxu0  ;;  %v342_v17 = vmax.f32 %v336_v13, 0.0  ;;  %v324_v18 = vadd.f32 %v312_v15, %v232_v10  ;;  %v1122_v10 = vld [vmem:[%s1493_s6] sm:$0xff]   ;;  %v1374_v13 = vld [vmem:[%s1494_s1 + $0x28] sm:$0x3] }
  0xf3   :  { %v313_v20 = vrot.slane %v293_v16, 2  ;;  %1068 = vmatpush3.bf16.msra.mxu1 %v1122_v10 }
  0xf4   :  { %v1064_v23 = vpop.f32.mrf.mxu0  ;;  %v355_v24 = vsel %vm348_vm5, %v342_v17, 0.0  ;;  %v337_v22 = vadd.f32 %v965_v48, %v324_v18  ;;  %1097 = vmatprep.subr.bf16.mxu1 %v1149_v0 }
  0xf5   :  { %v314_v25 = vsel %vm303_vm4, %v311_v9, %v313_v20  ;;  %v326_v27 = vadd.f32 %v313_v20, %v234_v19  ;;  %356 = vadd.xlane.f32.xlu1 %v355_v24  ;;  %v1355_v9 = vld [vmem:[%s1494_s1 + $0x18] sm:$0xff] }
  0xf6   :  { %v343_v28 = vmax.f32 %v337_v22, 0.0  ;;  %v325_v29 = vadd.f32 %v314_v25, %v233_v21 }
  0xf7   :  { %v339_v31 = vadd.f32 %v965_v48, %v326_v27 }
  0xf8   :  { %v358_v32 = vsel %vm348_vm5, %v343_v28, 0.0  ;;  %v338_v33 = vadd.f32 %v965_v48, %v325_v29 }
  0xf9   :  { %359 = vadd.xlane.f32.xlu1 %v358_v32  ;;  %v345_v30 = vmax.f32 %v339_v31, 0.0 }
  0xfa   :  { %v344_v34 = vmax.f32 %v338_v33, 0.0  ;;  %v966_v33 = vld [vmem:[%s1495_s4] ss:$0 sm:$0xff] }
  0xfb   :  { %v365_v26 = vsel %vm364_vm6, %v345_v30, 0.0 }
  0xfc   :  { %v361_v35 = vsel %vm348_vm5, %v344_v34, 0.0 }
  0xfd   :  { %366 = vadd.xlane.f32.xlu1 %v365_v26  ;;  %362 = vadd.xlane.f32.xlu0 %v361_v35 }
 0x176   :  { %v351_v37 = vpop.xlane.xlu0 %350 }
 0x177   :  { %v369_v38 = vmul.f32 0.03125, %v351_v37 }
 0x179   :  { %v1296_v39 = vsub.f32 %v340_v59, %v369_v38  ;;  %v967_v38 = vld [vmem:[%s1496_s5] ss:$0 sm:$0xff] }
 0x17a   :  { %v354_v40 = vpop.xlane.xlu0 %353 }
 0x17b   :  { %v370_v41 = vmul.f32 0.03125, %v354_v40  ;;  %v381_v42 = vmul.f32 %v1296_v39, %v1296_v39 }
 0x17d   :  { %v1300_v43 = vsub.f32 %v341_v7, %v370_v41  ;;  %v387_v44 = vsel %vm348_vm5, %v381_v42, 0.0  ;;  %v1123_v7 = vld [vmem:[%s1493_s6 + $0x18] sm:$0xff]  }
 0x17e   :  { %v357_v45 = vpop.xlane.xlu1 %356  ;;  %388 = vadd.xlane.f32.xlu0 %v387_v44  ;;  %1082 = vmatpush3.bf16.msra.mxu0 %v1123_v7 }
 0x17f   :  { %v371_v46 = vmul.f32 0.03125, %v357_v45  ;;  %v382_v47 = vmul.f32 %v1300_v43, %v1300_v43  ;;  %1083 = vmatprep.subr.bf16.mxu0 %v1149_v0 }
 0x181   :  { %v1305_v48 = vsub.f32 %v342_v17, %v371_v46  ;;  %v390_v49 = vsel %vm348_vm5, %v382_v47, 0.0 }
 0x182   :  { %v360_v50 = vpop.xlane.xlu1 %359  ;;  %391 = vadd.xlane.f32.xlu1 %v390_v49  ;;  %1084 = vmatpush3.bf16.msra.mxu0 %v1124_v11 }
 0x183   :  { %v372_v51 = vmul.f32 0.03125, %v360_v50  ;;  %v383_v52 = vmul.f32 %v1305_v48, %v1305_v48 }
 0x185   :  { %v1310_v53 = vsub.f32 %v343_v28, %v372_v51  ;;  %v393_v54 = vsel %vm348_vm5, %v383_v52, 0.0 }
 0x186   :  { %v367_v55 = vpop.xlane.xlu1 %366  ;;  %394 = vadd.xlane.f32.xlu0 %v393_v54  ;;  %v363_v56 = vpop.xlane.xlu0 %362 }
 0x187   :  { %v374_v57 = vmul.f32 0.03125, %v367_v55  ;;  %v373_v58 = vmul.f32 0.03125, %v363_v56  ;;  %v384_v59 = vmul.f32 %v1310_v53, %v1310_v53  ;;  %v1125_v55 = vld [vmem:[%s1493_s6 + $0x28] sm:$0xff]  }
 0x189   :  { %v1315_v60 = vsub.f32 %v345_v30, %v374_v57  ;;  %v1317_v61 = vsub.f32 %v344_v34, %v373_v58  ;;  %v396_v62 = vsel %vm348_vm5, %v384_v59, 0.0 }
 0x18a   :  { %397 = vadd.xlane.f32.xlu1 %v396_v62 }
 0x18b   :  { %v386_v63 = vmul.f32 %v1315_v60, %v1315_v60  ;;  %v385_v1 = vmul.f32 %v1317_v61, %v1317_v61 }
 0x18d   :  { %v402_v2 = vsel %vm364_vm6, %v386_v63, 0.0  ;;  %v399_v3 = vsel %vm348_vm5, %v385_v1, 0.0 }
 0x18e   :  { %403 = vadd.xlane.f32.xlu1 %v402_v2  ;;  %400 = vadd.xlane.f32.xlu0 %v399_v3 }
 0x19f   :  { %460 = vperm.xlu1 %1117, %v1333_v5  }
 0x1a3   :  { %465 = vperm.xlu1 %1117, %v1339_v6  }
 0x1a4   :  { %455 = vperm.xlu0 %1116, %v1347_v8  }
 0x1a7   :  { %470 = vperm.xlu1 %1117, %v1355_v9  }
 0x1ab   :  { %475 = vperm.xlu1 %1117, %v1368_v12  }
 0x1af   :  { %480 = vperm.xlu1 %1117, %v1374_v13  }
 0x207   :  { %v389_v14 = vpop.xlane.xlu0 %388 }
 0x208   :  { %v405_v15 = vmul.f32 0.03125, %v389_v14 }
 0x20a   :  { %v411_v16 = vadd.f32 0.0001, %v405_v15 }
 0x20b   :  { %v392_v17 = vpop.xlane.xlu1 %391 }
 0x20c   :  { %1127 = vrsqrt.f32 %v411_v16  ;;  %v406_v18 = vmul.f32 0.03125, %v392_v17 }
 0x20e   :  { %v412_v19 = vadd.f32 0.0001, %v406_v18 }
 0x20f   :  { %v395_v20 = vpop.xlane.xlu0 %394 }
 0x210   :  { %1129 = vrsqrt.f32 %v412_v19  ;;  %v407_v21 = vmul.f32 0.03125, %v395_v20 }
 0x212   :  { %v413_v23 = vadd.f32 0.0001, %v407_v21 }
 0x213   :  { %v398_v24 = vpop.xlane.xlu1 %397 }
 0x214   :  { %1131 = vrsqrt.f32 %v413_v23  ;;  %v408_v22 = vmul.f32 0.03125, %v398_v24 }
 0x216   :  { %v414_v25 = vadd.f32 0.0001, %v408_v22 }
 0x217   :  { %v404_v27 = vpop.xlane.xlu1 %403  ;;  %v401_v28 = vpop.xlane.xlu0 %400 }
 0x218   :  { %1133 = vrsqrt.f32 %v414_v25  ;;  %v410_v29 = vmul.f32 0.03125, %v404_v27  ;;  %v409_v31 = vmul.f32 0.03125, %v401_v28 }
 0x219   :  { %v1128_v32 = vpop.eup %1127 }
 0x21a   :  { %v416_v30 = vadd.f32 0.0001, %v410_v29  ;;  %v415_v34 = vadd.f32 0.0001, %v409_v31  ;;  %v423_v26 = vmul.f32 %v1128_v32, %v1296_v39 }
 0x21b   :  { %v461_v35 = vpop.permute.xlu1 %460 }
 0x21c   :  { %1135 = vrsqrt.f32 %v416_v30  ;;  %v435_v36 = vmul.f32 %v966_v33, %v423_v26 }
 0x21d   :  { %v1130_v37 = vpop.eup %1129  ;;  %1137 = vrsqrt.f32 %v415_v34 }
 0x21e   :  { %v424_v40 = vmul.f32 %v1130_v37, %v1300_v43  ;;  %v447_v44 = vadd.f32 %v967_v38, %v435_v36 }
 0x21f   :  { %v466_v41 = vpop.permute.xlu1 %465  ;;  %v456_v46 = vpop.permute.xlu0 %455 }
 0x220   :  { %v436_v42 = vmul.f32 %v966_v33, %v424_v40  ;;  %v483_v51 = vmul.f32 %v456_v46, %v447_v44 }
 0x221   :  { %v1132_v45 = vpop.eup %1131 }
 0x222   :  { %v448_v47 = vadd.f32 %v967_v38, %v436_v42  ;;  %v425_v49 = vmul.f32 %v1132_v45, %v1305_v48  ;;  %v1126_v48 = vld [vmem:[%s1493_s6 + $0x20] sm:$0xff]  }
 0x223   :  { %v471_v54 = vpop.permute.xlu1 %470 }
 0x224   :  { %v484_v39 = vmul.f32 %v461_v35, %v448_v47  ;;  %v437_v50 = vmul.f32 %v966_v33, %v425_v49 }
 0x225   :  { %v1134_v52 = vpop.eup %1133 }
 0x226   :  { %v489_v56 = vpack.c.bf16 %v484_v39, %v483_v51  ;;  %v426_v43 = vmul.f32 %v1134_v52, %v1310_v53  ;;  %v449_v57 = vadd.f32 %v967_v38, %v437_v50 }
 0x227   :  { %v476_v53 = vpop.permute.xlu1 %475 }
 0x228   :  { %v438_v58 = vmul.f32 %v966_v33, %v426_v43  ;;  %1070 = vmatmul.mubr.msk.bf16.vlgmr.msra.gmra.mxu1 %vm348_vm5, %v489_v56  ;;  %1086 = vmatmul.mubr.msk.bf16.vlgmr.msra.gmra.mxu0 %vm348_vm5, %v489_v56  ;;  %v485_v3 = vmul.f32 %v466_v41, %v449_v57  ;;  %v991_v57 = vld [vmem:[%s1497_s7] ss:$0 sm:$0xff] }
 0x229   :  { %v1136_v59 = vpop.eup %1135  ;;  %1098 = vmatpush3.bf16.msra.mxu1 %v1125_v55  ;;  %1073 = vmatprep.mubr.msk.bf16.mxu1 %vm1150_vm1, %v1149_v0 }
 0x22a   :  { %v1138_v62 = vpop.eup %1137  ;;  %v450_v63 = vadd.f32 %v967_v38, %v438_v58  ;;  %v428_v1 = vmul.f32 %v1136_v59, %v1315_v60  ;;  %1089 = vmatprep.mubr.msk.bf16.mxu0 %vm1150_vm1, %v1149_v0  ;;  %1099 = vmatprep.subr.bf16.mxu1 %v1149_v0 }
 0x22b   :  { %v427_v2 = vmul.f32 %v1138_v62, %v1317_v61  ;;  %v481_v60 = vpop.permute.xlu1 %480 }
 0x22c   :  { %v486_v4 = vmul.f32 %v471_v54, %v450_v63  ;;  %v440_v7 = vmul.f32 %v966_v33, %v428_v1 }
 0x22d   :  { %v439_v10 = vmul.f32 %v966_v33, %v427_v2  ;;  %1100 = vmatpush3.bf16.msra.mxu1 %v1126_v48 }
 0x22e   :  { %v490_v11 = vpack.c.bf16 %v486_v4, %v485_v3  ;;  %v452_v14 = vadd.f32 %v967_v38, %v440_v7 }
 0x22f   :  { %v451_v15 = vadd.f32 %v967_v38, %v439_v10 }
 0x230   :  { %1074 = vmatmul.mubr.msk.bf16.gmra.mxu1 %vm348_vm5, %v490_v11  ;;  %1090 = vmatmul.mubr.msk.bf16.gmra.mxu0 %vm348_vm5, %v490_v11  ;;  %v488_v16 = vmul.f32 %v481_v60, %v452_v14 }
 0x231   :  { %1077 = vmatprep.mubr.msk.bf16.mxu1 %vm1150_vm1, %v1149_v0  ;;  %1093 = vmatprep.mubr.msk.bf16.mxu0 %vm1150_vm1, %v1149_v0  ;;  %v487_v61 = vmul.f32 %v476_v53, %v451_v15 }
 0x233   :  { %v491_v17 = vpack.c.bf16 %v488_v16, %v487_v61 }
 0x238   :  { %1078 = vmatmul.mubr.msk.bf16.gmra.mxu1 %vm348_vm5, %v491_v17  ;;  %1094 = vmatmul.mubr.msk.bf16.gmra.mxu0 %vm348_vm5, %v491_v17 }
 0x239   :  { %1101 = vmatprep.mubr.msk.bf16.mxu1 %vm1150_vm1, %v1149_v0 }
 0x240   :  { %1102 = vmatmul.mubr.msk.bf16.vlgmr.msra.gmra.mxu1 %vm348_vm5, %v489_v56 }
 0x241   :  { %1105 = vmatprep.mubr.msk.bf16.mxu1 %vm1150_vm1, %v1149_v0 }
 0x248   :  { %1106 = vmatmul.mubr.msk.bf16.gmra.mxu1 %vm348_vm5, %v490_v11 }
 0x249   :  { %1109 = vmatprep.mubr.msk.bf16.mxu1 %vm1150_vm1, %v1149_v0 }
 0x250   :  { %1110 = vmatmul.mubr.msk.bf16.gmra.mxu1 %vm348_vm5, %v491_v17 }
 0x2e8   :  { %v551_v18 = vpop.f32.mrf.mxu1  ;;  %v624_v19 = vpop.f32.mrf.mxu0 }
 0x2e9   :  { %v653_v45 = vrot.slane %v624_v19, 1 }
 0x2ea   :  { %v1071_v20 = vpop.f32.mrf.mxu1  ;;  %v1087_v21 = vpop.f32.mrf.mxu0 }
 0x2ec   :  { %v554_v23 = vpop.f32.mrf.mxu1  ;;  %v627_v24 = vpop.f32.mrf.mxu0 }
 0x2ed   :  { %v654_v42 = vrot.slane %v627_v24, 1 }
 0x2ee   :  { %v1072_v22 = vpop.f32.mrf.mxu1  ;;  %v1088_v25 = vpop.f32.mrf.mxu0 }
 0x2ef   :  { %v655_v47 = vsel %vm211_vm3, %v653_v45, %v654_v42 }
 0x2f0   :  { %v559_v27 = vpop.f32.mrf.mxu1  ;;  %v632_v28 = vpop.f32.mrf.mxu0  ;;  %v669_v52 = vadd.f32 %v655_v47, %v551_v18 }
 0x2f1   :  { %v656_v49 = vrot.slane %v632_v28, 1 }
 0x2f2   :  { %v1075_v29 = vpop.f32.mrf.mxu1  ;;  %v1091_v31 = vpop.f32.mrf.mxu0 }
 0x2f3   :  { %v657_v55 = vsel %vm211_vm3, %v654_v42, %v656_v49 }
 0x2f4   :  { %v562_v32 = vpop.f32.mrf.mxu1  ;;  %v635_v33 = vpop.f32.mrf.mxu0  ;;  %v670_v62 = vadd.f32 %v657_v55, %v554_v23 }
 0x2f5   :  { %v658_v56 = vrot.slane %v635_v33, 1 }
 0x2f6   :  { %v1076_v30 = vpop.f32.mrf.mxu1  ;;  %v1092_v34 = vpop.f32.mrf.mxu0 }
 0x2f7   :  { %v659_v53 = vsel %vm211_vm3, %v656_v49, %v658_v56 }
 0x2f8   :  { %v567_v26 = vpop.f32.mrf.mxu1  ;;  %v640_v0 = vpop.f32.mrf.mxu0  ;;  %v671_v14 = vadd.f32 %v659_v53, %v559_v27 }
 0x2f9   :  { %v660_v2 = vrot.slane %v640_v0, 1 }
 0x2fa   :  { %v1079_v35 = vpop.f32.mrf.mxu1  ;;  %v1095_v36 = vpop.f32.mrf.mxu0 }
 0x2fb   :  { %v661_v16 = vsel %vm211_vm3, %v658_v56, %v660_v2 }
 0x2fc   :  { %v570_v37 = vpop.f32.mrf.mxu1  ;;  %v643_v38 = vpop.f32.mrf.mxu0  ;;  %v672_v24 = vadd.f32 %v661_v16, %v562_v32 }
 0x2fd   :  { %v662_v17 = vrot.slane %v643_v38, 1 }
 0x2fe   :  { %v1080_v40 = vpop.f32.mrf.mxu1  ;;  %v1096_v41 = vpop.f32.mrf.mxu0 }
 0x2ff   :  { %v663_v27 = vsel %vm211_vm3, %v660_v2, %v662_v17 }
 0x300   :  { %v725_v44 = vpop.f32.mrf.mxu1  ;;  %v673_v0 = vadd.f32 %v663_v27, %v567_v26  ;;  %v992_v27 = vld [vmem:[%s1499_s8] ss:$0 sm:$0xff] }
 0x301   :  { %v754_v50 = vrot.slane %v725_v44, 2 }
 0x302   :  { %v1103_v46 = vpop.f32.mrf.mxu1 }
 0x304   :  { %v728_v39 = vpop.f32.mrf.mxu1 }
 0x305   :  { %v755_v51 = vrot.slane %v728_v39, 2 }
 0x306   :  { %v1104_v54 = vpop.f32.mrf.mxu1 }
 0x307   :  { %v756_v43 = vsel %vm303_vm4, %v754_v50, %v755_v51 }
 0x308   :  { %v733_v58 = vpop.f32.mrf.mxu1  ;;  %v770_v59 = vadd.f32 %v756_v43, %v669_v52 }
 0x309   :  { %v757_v48 = vrot.slane %v733_v58, 2 }
 0x30a   :  { %v1107_v63 = vpop.f32.mrf.mxu1  ;;  %v782_v1 = vadd.f32 %v991_v57, %v770_v59 }
 0x30b   :  { %v758_v3 = vsel %vm303_vm4, %v755_v51, %v757_v48 }
 0x30c   :  { %v736_v4 = vpop.f32.mrf.mxu1  ;;  %v787_v7 = vmax.f32 %v782_v1, 0.0  ;;  %v771_v10 = vadd.f32 %v758_v3, %v670_v62 }
 0x30d   :  { %v759_v11 = vrot.slane %v736_v4, 2 }
 0x30e   :  { %v1108_v15 = vpop.f32.mrf.mxu1  ;;  %v794_v60 = vsel %vm348_vm5, %v787_v7, 0.0  ;;  %v783_v61 = vadd.f32 %v991_v57, %v771_v10 }
 0x30f   :  { %v760_v18 = vsel %vm303_vm4, %v757_v48, %v759_v11  ;;  %795 = vadd.xlane.f32.xlu1 %v794_v60 }
 0x310   :  { %v741_v19 = vpop.f32.mrf.mxu1  ;;  %v788_v20 = vmax.f32 %v783_v61, 0.0  ;;  %v772_v21 = vadd.f32 %v760_v18, %v671_v14 }
 0x311   :  { %v761_v23 = vrot.slane %v741_v19, 2 }
 0x312   :  { %v1111_v22 = vpop.f32.mrf.mxu1  ;;  %v797_v25 = vsel %vm348_vm5, %v788_v20, 0.0  ;;  %v784_v28 = vadd.f32 %v991_v57, %v772_v21 }
 0x313   :  { %v762_v29 = vsel %vm303_vm4, %v759_v11, %v761_v23  ;;  %798 = vadd.xlane.f32.xlu0 %v797_v25  ;;  %v17_v11 = vstv %s1498_s11 }
 0x314   :  { %v744_v31 = vpop.f32.mrf.mxu1  ;;  %v789_v33 = vmax.f32 %v784_v28, 0.0  ;;  %v773_v30 = vadd.f32 %v762_v29, %v672_v24  ;;  %18 = vst [vmem:[#allocation2] sm:$0x1] %v17_v11 }
 0x315   :  { %v763_v34 = vrot.slane %v744_v31, 2 }
 0x316   :  { %v1112_v35 = vpop.f32.mrf.mxu1  ;;  %v800_v36 = vsel %vm348_vm5, %v789_v33, 0.0  ;;  %v785_v37 = vadd.f32 %v991_v57, %v773_v30 }
 0x317   :  { %v764_v32 = vsel %vm303_vm4, %v761_v23, %v763_v34  ;;  %801 = vadd.xlane.f32.xlu1 %v800_v36 }
 0x318   :  { %v790_v38 = vmax.f32 %v785_v37, 0.0  ;;  %v774_v40 = vadd.f32 %v764_v32, %v673_v0  ;;  %v994_v0 = vld [vmem:[%s1501_s10] ss:$0 sm:$0xff] }
 0x31a   :  { %v803_v41 = vsel %vm348_vm5, %v790_v38, 0.0  ;;  %v786_v42 = vadd.f32 %v991_v57, %v774_v40 }
 0x31b   :  { %804 = vadd.xlane.f32.xlu1 %v803_v41 }
 0x31c   :  { %v791_v44 = vmax.f32 %v786_v42, 0.0 }
 0x31e   :  { %v806_v45 = vsel %vm348_vm5, %v791_v44, 0.0 }
 0x31f   :  { %807 = vadd.xlane.f32.xlu0 %v806_v45 }
 0x398   :  { %v796_v46 = vpop.xlane.xlu1 %795 }
 0x399   :  { %v809_v47 = vmul.f32 0.03125, %v796_v46 }
 0x39b   :  { %v814_v26 = vsub.f32 %v787_v7, %v809_v47 }
 0x39c   :  { %v799_v49 = vpop.xlane.xlu0 %798 }
 0x39d   :  { %v810_v39 = vmul.f32 0.03125, %v799_v49  ;;  %v819_v50 = vmul.f32 %v814_v26, %v814_v26 }
 0x39f   :  { %v815_v51 = vsub.f32 %v788_v20, %v810_v39  ;;  %v824_v52 = vsel %vm348_vm5, %v819_v50, 0.0 }
 0x3a0   :  { %v802_v54 = vpop.xlane.xlu1 %801  ;;  %825 = vadd.xlane.f32.xlu1 %v824_v52 }
 0x3a1   :  { %v811_v55 = vmul.f32 0.03125, %v802_v54  ;;  %v820_v56 = vmul.f32 %v815_v51, %v815_v51 }
 0x3a3   :  { %v816_v43 = vsub.f32 %v789_v33, %v811_v55  ;;  %v827_v57 = vsel %vm348_vm5, %v820_v56, 0.0  ;;  %v993_v33 = vld [vmem:[%s1500_s9] ss:$0 sm:$0xff] }
 0x3a4   :  { %v805_v58 = vpop.xlane.xlu1 %804  ;;  %828 = vadd.xlane.f32.xlu0 %v827_v57 }
 0x3a5   :  { %v812_v59 = vmul.f32 0.03125, %v805_v58  ;;  %v821_v48 = vmul.f32 %v816_v43, %v816_v43 }
 0x3a7   :  { %v817_v62 = vsub.f32 %v790_v38, %v812_v59  ;;  %v830_v63 = vsel %vm348_vm5, %v821_v48, 0.0 }
 0x3a8   :  { %831 = vadd.xlane.f32.xlu1 %v830_v63  ;;  %v808_v1 = vpop.xlane.xlu0 %807  ;;  %v920_v63 = vrot.slane %v1347_v8, 1 }
 0x3a9   :  { %v813_v53 = vmul.f32 0.03125, %v808_v1  ;;  %v822_v2 = vmul.f32 %v817_v62, %v817_v62  ;;  %v995_v1 = vld [vmem:[#allocation2] ss:$0 sm:$0xff] }
 0x3ab   :  { %v818_v3 = vsub.f32 %v791_v44, %v813_v53  ;;  %v833_v4 = vsel %vm348_vm5, %v822_v2, 0.0  ;;  %v923_v53 = vrot.slane %v1339_v6, 1  ;;  %v927_v6 = vrot.slane %v1368_v12, 1 }
 0x3ac   :  { %834 = vadd.xlane.f32.xlu0 %v833_v4 }
 0x3ad   :  { %v823_v7 = vmul.f32 %v818_v3, %v818_v3 }
 0x3af   :  { %v836_v10 = vsel %vm348_vm5, %v823_v7, 0.0 }
 0x3b0   :  { %837 = vadd.xlane.f32.xlu1 %v836_v10  ;;  %v925_v10 = vrot.slane %v1355_v9, 1 }
 0x429   :  { %v826_v14 = vpop.xlane.xlu1 %825 }
 0x42a   :  { %v839_v15 = vmul.f32 0.03125, %v826_v14 }
 0x42c   :  { %v844_v60 = vadd.f32 0.0001, %v839_v15  ;;  %v926_v15 = vsel %vm211_vm3, %v923_v53, %v925_v10 }
 0x42d   :  { %v829_v61 = vpop.xlane.xlu0 %828 }
 0x42e   :  { %1139 = vrsqrt.f32 %v844_v60  ;;  %v840_v16 = vmul.f32 0.03125, %v829_v61 }
 0x430   :  { %v845_v17 = vadd.f32 0.0001, %v840_v16  ;;  %v929_v16 = vrot.slane %v1374_v13, 1 }
 0x431   :  { %v832_v18 = vpop.xlane.xlu1 %831 }
 0x432   :  { %1141 = vrsqrt.f32 %v845_v17  ;;  %v841_v19 = vmul.f32 0.03125, %v832_v18  ;;  %v928_v17 = vsel %vm211_vm3, %v925_v10, %v927_v6 }
 0x434   :  { %v846_v20 = vadd.f32 0.0001, %v841_v19 }
 0x435   :  { %v835_v21 = vpop.xlane.xlu0 %834 }
 0x436   :  { %1143 = vrsqrt.f32 %v846_v20  ;;  %v842_v23 = vmul.f32 0.03125, %v835_v21  ;;  %v930_v20 = vsel %vm211_vm3, %v927_v6, %v929_v16 }
 0x438   :  { %v847_v24 = vadd.f32 0.0001, %v842_v23 }
 0x439   :  { %v838_v22 = vpop.xlane.xlu1 %837 }
 0x43a   :  { %1145 = vrsqrt.f32 %v847_v24  ;;  %v843_v25 = vmul.f32 0.03125, %v838_v22 }
 0x43b   :  { %v1140_v28 = vpop.eup %1139 }
 0x43c   :  { %v848_v29 = vadd.f32 0.0001, %v843_v25  ;;  %v854_v31 = vmul.f32 %v1140_v28, %v814_v26 }
 0x43e   :  { %1147 = vrsqrt.f32 %v848_v29  ;;  %v865_v30 = vmul.f32 %v992_v27, %v854_v31 }
 0x43f   :  { %v1142_v34 = vpop.eup %1141 }
 0x440   :  { %v876_v35 = vadd.f32 %v993_v33, %v865_v30  ;;  %v855_v36 = vmul.f32 %v1142_v34, %v815_v51 }
 0x442   :  { %v888_v37 = vmul.f32 %v994_v0, %v876_v35  ;;  %v866_v32 = vmul.f32 %v992_v27, %v855_v36 }
 0x443   :  { %v1144_v38 = vpop.eup %1143 }
 0x444   :  { %v893_v40 = vsel %vm348_vm5, %v888_v37, 0.0  ;;  %v877_v41 = vadd.f32 %v993_v33, %v866_v32  ;;  %v856_v42 = vmul.f32 %v1144_v38, %v816_v43 }
 0x445   :  { %894 = vadd.xlane.f32.xlu0 %v893_v40 }
 0x446   :  { %v889_v44 = vmul.f32 %v994_v0, %v877_v41  ;;  %v867_v45 = vmul.f32 %v992_v27, %v856_v42 }
 0x447   :  { %v1146_v46 = vpop.eup %1145 }
 0x448   :  { %v896_v47 = vsel %vm348_vm5, %v889_v44, 0.0  ;;  %v878_v26 = vadd.f32 %v993_v33, %v867_v45  ;;  %v857_v49 = vmul.f32 %v1146_v46, %v817_v62  ;;  %v921_v62 = vrot.slane %v1333_v5, 1 }
 0x449   :  { %897 = vadd.xlane.f32.xlu1 %v896_v47 }
 0x44a   :  { %v890_v39 = vmul.f32 %v994_v0, %v878_v26  ;;  %v868_v50 = vmul.f32 %v992_v27, %v857_v49  ;;  %v922_v2 = vsel %vm211_vm3, %v920_v63, %v921_v62  ;;  %v924_v11 = vsel %vm211_vm3, %v921_v62, %v923_v53 }
 0x44b   :  { %v1148_v52 = vpop.eup %1147 }
 0x44c   :  { %v899_v51 = vsel %vm348_vm5, %v890_v39, 0.0  ;;  %v879_v54 = vadd.f32 %v993_v33, %v868_v50  ;;  %v858_v55 = vmul.f32 %v1148_v52, %v818_v3 }
 0x44d   :  { %900 = vadd.xlane.f32.xlu0 %v899_v51 }
 0x44e   :  { %v891_v56 = vmul.f32 %v994_v0, %v879_v54  ;;  %v869_v57 = vmul.f32 %v992_v27, %v858_v55 }
 0x450   :  { %v902_v43 = vsel %vm348_vm5, %v891_v56, 0.0  ;;  %v880_v58 = vadd.f32 %v993_v33, %v869_v57 }
 0x451   :  { %903 = vadd.xlane.f32.xlu1 %v902_v43 }
 0x452   :  { %v892_v59 = vmul.f32 %v994_v0, %v880_v58 }
 0x454   :  { %v905_v48 = vsel %vm348_vm5, %v892_v59, 0.0 }
 0x455   :  { %906 = vadd.xlane.f32.xlu0 %v905_v48 }
 0x4ce   :  { %v895_v3 = vpop.xlane.xlu0 %894 }
 0x4cf   :  { %v915_v4 = vadd.f32 %v995_v1, %v895_v3 }
 0x4d1   :  { %v936_v7 = vmul.f32 %v922_v2, %v915_v4 }
 0x4d2   :  { %v898_v14 = vpop.xlane.xlu1 %897 }
 0x4d3   :  { %942 = vst.msk [vmem:[%s1502_s12] sm:$0xff] %vm941_vm7, %v936_v7  ;;  %v916_v5 = vadd.f32 %v995_v1, %v898_v14 }
 0x4d5   :  { %v937_v8 = vmul.f32 %v924_v11, %v916_v5 }
 0x4d6   :  { %v901_v60 = vpop.xlane.xlu0 %900 }
 0x4d7   :  { %943 = vst.msk [vmem:[%s1502_s12 + $0x8] sm:$0xff] %vm941_vm7, %v937_v8  ;;  %v917_v9 = vadd.f32 %v995_v1, %v901_v60 }
 0x4d9   :  { %v938_v61 = vmul.f32 %v926_v15, %v917_v9 }
 0x4da   :  { %v904_v18 = vpop.xlane.xlu1 %903 }
 0x4db   :  { %944 = vst.msk [vmem:[%s1502_s12 + $0x10] sm:$0xff] %vm941_vm7, %v938_v61  ;;  %v918_v12 = vadd.f32 %v995_v1, %v904_v18 }
 0x4dd   :  { %v939_v19 = vmul.f32 %v928_v17, %v918_v12 }
 0x4de   :  { %v907_v21 = vpop.xlane.xlu0 %906 }
 0x4df   :  { %945 = vst.msk [vmem:[%s1502_s12 + $0x18] sm:$0xff] %vm941_vm7, %v939_v19  ;;  %v919_v23 = vadd.f32 %v995_v1, %v907_v21 }
 0x4e1   :  { %v940_v13 = vmul.f32 %v930_v20, %v919_v23 }
 0x4e3   :  { %946 = vst.msk [vmem:[%s1502_s12 + $0x20] sm:$0xff] %vm941_vm7, %v940_v13 }

</bundles_post_ra>
